<compile_context>
chip_gen: v7x
topology: tpu7x:2x2x1
jax: 0.10.0
libtpu: 0.0.40
codegen_flags: <defaults>
</compile_context>

<pallas_src>
import functools

import jax
import jax.numpy as jnp
from jax import lax
from jax.experimental import pallas as pl
from jax.experimental.pallas import tpu as pltpu


def _round_up(a, b):
    return (a + b - 1) // b * b


def _choose_spatial_tile(sp, cap=8192, min_pref=1024):
    """Pick lane tile ts (multiple of 128) and padded spatial size sp_pad (multiple of ts).

    Prefers an exact divisor of sp (no pad columns, no wasted DMA); otherwise pads minimally
    with near-cap tiles (per-grid-step overhead ~0.35us -> bigger tiles win).
    """
    cap = max(128, cap // 128 * 128)
    if sp <= cap:
        ts = _round_up(sp, 128)
        return ts, ts
    for cand in range(cap, min_pref - 1, -128):           # exact divisor, no padding
        if sp % cand == 0:
            return cand, sp
    n_steps = -(-sp // cap)                                # minimal padding, big tiles
    ts = _round_up(-(-sp // n_steps), 128)
    return ts, ts * n_steps


# ---------------------------------------------------------------------------
# Pass 1: per-phase (Cout, K_sub) @ (K_sub, TS) matmul + per-(n,phase) sum / sum-of-squares
# ---------------------------------------------------------------------------
def _matmul_stats_kernel(w_ref, x_ref, y_ref, sum_ref, sumsq_ref):
    # w_ref:   (1, Cout, Ksub)   bf16   (per-phase weight)
    # x_ref:   (1, 1, Ksub, ts)  bf16
    # y_ref:   (1, 1, Cout, ts)  bf16   (stored bf16; stats taken from the f32 value)
    # sum_ref / sumsq_ref: (1, 1, Cout, 1) f32, revisited/accumulated across the spatial axis
    @pl.when(pl.program_id(2) == 0)
    def _init():
        sum_ref[...] = jnp.zeros_like(sum_ref)
        sumsq_ref[...] = jnp.zeros_like(sumsq_ref)

    y = jnp.dot(w_ref[0], x_ref[0, 0], preferred_element_type=jnp.float32)  # (Cout, ts) f32
    y_ref[0, 0] = y.astype(y_ref.dtype)
    sum_ref[0, 0] += jnp.sum(y, axis=1, keepdims=True)
    sumsq_ref[0, 0] += jnp.sum(y * y, axis=1, keepdims=True)


def _matmul_stats(w_mat, x_col, *, ts):
    N, n_ph, Ksub, sp_pad = x_col.shape
    Cout = w_mat.shape[1]
    y_bytes = N * n_ph * Cout * sp_pad * 2
    cost = pl.CostEstimate(
        flops=2 * N * n_ph * Cout * Ksub * sp_pad + 3 * N * n_ph * Cout * sp_pad,
        transcendentals=0,
        bytes_accessed=x_col.size * 2 + w_mat.size * 2 + y_bytes + 2 * N * n_ph * Cout * 4,
    )
    return pl.pallas_call(
        _matmul_stats_kernel,
        out_shape=(
            jax.ShapeDtypeStruct((N, n_ph, Cout, sp_pad), jnp.bfloat16),
            jax.ShapeDtypeStruct((N, n_ph, Cout, 1), jnp.float32),
            jax.ShapeDtypeStruct((N, n_ph, Cout, 1), jnp.float32),
        ),
        grid_spec=pltpu.PrefetchScalarGridSpec(
            num_scalar_prefetch=0,
            grid=(N, n_ph, sp_pad // ts),
            in_specs=[
                pl.BlockSpec((1, Cout, Ksub), lambda n, ph, s: (ph, 0, 0)),
                pl.BlockSpec((1, 1, Ksub, ts), lambda n, ph, s: (n, ph, 0, s)),
            ],
            out_specs=[
                pl.BlockSpec((1, 1, Cout, ts), lambda n, ph, s: (n, ph, 0, s)),
                pl.BlockSpec((1, 1, Cout, 1), lambda n, ph, s: (n, ph, 0, 0)),
                pl.BlockSpec((1, 1, Cout, 1), lambda n, ph, s: (n, ph, 0, 0)),
            ],
        ),
        compiler_params=pltpu.CompilerParams(
            # stats revisit across spatial -> "arbitrary"; (batch, phase) are parallel so
            # v7x's 2 TensorCores both get work even at N=1 (>=4 phase chunks).
            dimension_semantics=("parallel", "parallel", "arbitrary"),
        ),
        cost_estimate=cost,
    )(w_mat, x_col)


# ---------------------------------------------------------------------------
# Pass 2: fused stats-reduction + BatchNorm(scale/shift) + PReLU
#   scale/shift computed in-kernel from the per-(n,phase) partial sums (no XLA glue),
#   once per (n,phase) at the first spatial step, into persistent VMEM scratch.
# ---------------------------------------------------------------------------
def _bn_prelu_kernel(ssum_ref, ssq_ref, gamma_ref, beta_ref, alpha_ref, y_ref,
                     o_ref, scale_sc, shift_sc, *, inv_count, eps):
    @pl.when(pl.program_id(2) == 0)
    def _scales():
        # TODO(synk): single-pass E[y^2]-E[y]^2 in f32; switch to a shifted/Welford
        # accumulation if feature maps become very large (bias fold keeps means small here).
        ssum = jnp.sum(ssum_ref[...], axis=0)            # (Cout, 1)
        ssq = jnp.sum(ssq_ref[...], axis=0)              # (Cout, 1)
        mean = ssum * inv_count
        var = jnp.maximum(ssq * inv_count - mean * mean, 0.0)
        scale = gamma_ref[...] * lax.rsqrt(var + eps)
        scale_sc[...] = scale
        shift_sc[...] = beta_ref[...] - mean * scale

    z = y_ref[0, 0].astype(jnp.float32) * scale_sc[...] + shift_sc[...]   # (Cout, ts)
    o_ref[0, 0] = jnp.where(z > 0, z, alpha_ref[...] * z)


def _bn_prelu(y, ssum, ssq, gamma, beta, alpha, *, count, ts, eps=1e-5):
    N, n_ph, Cout, sp_pad = y.shape
    kernel = functools.partial(_bn_prelu_kernel, inv_count=float(1.0 / count), eps=float(eps))
    cost = pl.CostEstimate(
        flops=5 * N * n_ph * Cout * sp_pad,
        transcendentals=Cout,
        bytes_accessed=y.size * 2 + y.size * 4 + (ssum.size + ssq.size + 3 * Cout) * 4,
    )
    return pl.pallas_call(
        kernel,
        out_shape=jax.ShapeDtypeStruct((N, n_ph, Cout, sp_pad), jnp.float32),
        grid_spec=pltpu.PrefetchScalarGridSpec(
            num_scalar_prefetch=0,
            grid=(N, n_ph, sp_pad // ts),
            in_specs=[
                pl.BlockSpec((N * n_ph, Cout, 1), lambda n, ph, s: (0, 0, 0)),
                pl.BlockSpec((N * n_ph, Cout, 1), lambda n, ph, s: (0, 0, 0)),
                pl.BlockSpec((Cout, 1), lambda n, ph, s: (0, 0)),
                pl.BlockSpec((Cout, 1), lambda n, ph, s: (0, 0)),
                pl.BlockSpec((Cout, 1), lambda n, ph, s: (0, 0)),
                pl.BlockSpec((1, 1, Cout, ts), lambda n, ph, s: (n, ph, 0, s)),
            ],
            out_specs=pl.BlockSpec((1, 1, Cout, ts), lambda n, ph, s: (n, ph, 0, s)),
            scratch_shapes=[pltpu.VMEM((Cout, 1), jnp.float32),
                            pltpu.VMEM((Cout, 1), jnp.float32)],
        ),
        compiler_params=pltpu.CompilerParams(
            dimension_semantics=("parallel", "parallel", "arbitrary"),
        ),
        cost_estimate=cost,
    )(ssum.reshape(N * n_ph, Cout, 1), ssq.reshape(N * n_ph, Cout, 1),
      gamma, beta, alpha, y)


# ---------------------------------------------------------------------------
# Wrapper: ConvTranspose2dBlock forward
# ---------------------------------------------------------------------------
@functools.partial(jax.jit,
                   static_argnames=("stride", "padding", "output_padding", "dropout"))
def conv_transpose2d_block(x, weight, bias, gamma, beta, prelu_alpha, *,
                           stride, padding, output_padding, dropout=0.0):
    """x: (N, Cin, H, W) NCHW.  weight: (Cin, Cout, Kh, Kw) (PyTorch ConvTranspose2d layout).

    `bias` is accepted for interface parity but folded away: a per-channel constant added
    before batch-statistics BatchNorm is exactly cancelled by the mean subtraction.
    """
    if dropout:
        # TODO(synk): dropout>0 would need pltpu PRNG inside pass 1; module default is 0.
        raise NotImplementedError("dropout > 0 is not supported by this kernel")
    del bias  # mathematically a no-op before batch-stat BatchNorm
    N, Cin, H, W = x.shape
    _, Cout, Kh, Kw = weight.shape
    s, p, op = stride, padding, output_padding
    Ho = (H - 1) * s - 2 * p + Kh + op
    Wo = (W - 1) * s - 2 * p + Kw + op

    subpixel = (Kh % s == 0) and (Kw % s == 0) and (Ho % s == 0) and (Wo % s == 0)
    if subpixel:
        # stride^2 sub-pixel decomposition: for output phase (dh, dw),
        #   y[n,co, s*mh+dh, s*mw+dw] = sum_{ci,jh,jw} x[n,ci, mh+qh-jh, mw+qw-jw]
        #                                               * W[ci,co, rh+s*jh, rw+s*jw]
        # with r = (d+p) % s, q = (d+p) // s (out-of-range x -> 0).
        n_ph = s * s
        Jh, Jw = Kh // s, Kw // s
        Hp, Wp = Ho // s, Wo // s
        Ksub = Cin * Jh * Jw
        Sp = Hp * Wp
        q_max = (s - 1 + p) // s
        GLh, GRh = Jh - 1, max(0, Hp - 1 + q_max - (H - 1))
        GLw, GRw = Jw - 1, max(0, Wp - 1 + q_max - (W - 1))
        x_gpad = jnp.pad(x, ((0, 0), (0, 0), (GLh, GRh), (GLw, GRw)))

        phase_cols, phase_w = [], []
        for dh in range(s):
            rh, qh = (dh + p) % s, (dh + p) // s
            for dw in range(s):
                rw, qw = (dw + p) % s, (dw + p) // s
                taps = []
                for jh in range(Jh):
                    oh0 = qh - jh + GLh
                    for jw in range(Jw):
                        ow0 = qw - jw + GLw
                        taps.append(x_gpad[:, :, oh0:oh0 + Hp, ow0:ow0 + Wp])
                phase_cols.append(jnp.stack(taps, axis=2).reshape(N, Ksub, Sp))
                phase_w.append(
                    weight[:, :, rh::s, rw::s].transpose(1, 0, 2, 3).reshape(Cout, Ksub))
        # TODO(synk): the per-phase im2col still materializes (N, n_ph, Ksub, Sp) in HBM;
        # an in-kernel per-tap gather (pl.ANY + make_async_copy) would cut that further.
        x_col = jnp.stack(phase_cols, axis=1).astype(jnp.bfloat16)   # (N, n_ph, Ksub, Sp)
        w_mat = jnp.stack(phase_w, axis=0).astype(jnp.bfloat16)      # (n_ph, Cout, Ksub)
    else:
        # Fallback (stride does not divide kernel / output size): zero-upsample + im2col.
        n_ph = 1
        Ksub = Cin * Kh * Kw
        Sp = Ho * Wo
        Hu, Wu = (H - 1) * s + 1, (W - 1) * s + 1
        x_up = jnp.zeros((N, Cin, Hu, Wu), x.dtype).at[:, :, ::s, ::s].set(x)
        ph_, pw_ = Kh - 1 - p, Kw - 1 - p
        x_pad = jnp.pad(x_up, ((0, 0), (0, 0), (ph_, ph_ + op), (pw_, pw_ + op)))
        taps = [x_pad[:, :, kh:kh + Ho, kw:kw + Wo]
                for kh in range(Kh) for kw in range(Kw)]
        x_col = jnp.stack(taps, axis=2).reshape(N, 1, Ksub, Sp).astype(jnp.bfloat16)
        w_mat = (weight[:, :, ::-1, ::-1].transpose(1, 0, 2, 3)
                 .reshape(1, Cout, Ksub).astype(jnp.bfloat16))

    # lane tile over the per-phase spatial axis; pad columns (if any) are all-zero and
    # therefore stats-neutral because the conv bias is folded away.
    ts, sp_pad = _choose_spatial_tile(Sp)
    if sp_pad != Sp:
        x_col = jnp.pad(x_col, ((0, 0), (0, 0), (0, 0), (0, sp_pad - Sp)))

    # Pass 1: per-phase matmul (bf16 MXU, f32 acc) + per-(n,phase) partial sum / sumsq.
    y, ssum, ssq = _matmul_stats(w_mat, x_col, ts=ts)

    # Pass 2: fused stats reduction -> BatchNorm scale/shift -> PReLU (reads bf16 y).
    out = _bn_prelu(
        y, ssum, ssq,
        gamma.astype(jnp.float32).reshape(Cout, 1),
        beta.astype(jnp.float32).reshape(Cout, 1),
        prelu_alpha.astype(jnp.float32).reshape(Cout, 1),
        count=N * Ho * Wo, ts=ts,
    )

    if subpixel and s > 1:
        # pixel-shuffle interleave: (n, dh, dw, co, mh, mw) -> (n, co, mh, dh, mw, dw).
        # TODO(synk): could be folded into pass-2's output stores (in-kernel lane interleave
        # of the s column phases) to remove this output-sized XLA copy.
        Hp, Wp = Ho // s, Wo // s
        out = out[:, :, :, :Sp].reshape(N, s, s, Cout, Hp, Wp)
        out = out.transpose(0, 3, 4, 1, 5, 2).reshape(N, Cout, Ho, Wo)
    else:
        out = out[:, 0, :, :Sp].reshape(N, Cout, Ho, Wo)
    return out


# ---------------------------------------------------------------------------
# Pure-JAX reference (independent path through XLA conv)
# ---------------------------------------------------------------------------
def _reference(x, weight, bias, gamma, beta, prelu_alpha, *, stride, padding,
               output_padding, matmul_dtype=jnp.float32):
    Cin, Cout, Kh, Kw = weight.shape
    w_flip = weight[:, :, ::-1, ::-1].transpose(1, 0, 2, 3)   # (Cout, Cin, Kh, Kw)
    y = lax.conv_general_dilated(
        x.astype(matmul_dtype), w_flip.astype(matmul_dtype),
        window_strides=(1, 1),
        padding=[(Kh - 1 - padding, Kh - 1 - padding + output_padding),
                 (Kw - 1 - padding, Kw - 1 - padding + output_padding)],
        lhs_dilation=(stride, stride),
        dimension_numbers=("NCHW", "OIHW", "NCHW"),
        preferred_element_type=jnp.float32,
    ) + bias.reshape(1, Cout, 1, 1)
    mean = jnp.mean(y, axis=(0, 2, 3), keepdims=True)
    var = jnp.mean((y - mean) ** 2, axis=(0, 2, 3), keepdims=True)
    y_hat = (y - mean) * lax.rsqrt(var + 1e-5)
    z = gamma.reshape(1, Cout, 1, 1) * y_hat + beta.reshape(1, Cout, 1, 1)
    a = prelu_alpha.reshape(1, Cout, 1, 1)
    return jnp.where(z > 0, z, a * z)


if __name__ == "__main__":
    # Module hyperparameters (typical 2x-upsampling transposed conv)
    in_channels, out_channels = 4, 8
    kernel_size, stride, padding, output_padding = 4, 2, 1, 0

    key = jax.random.PRNGKey(0)
    kx, kw, kb = jax.random.split(key, 3)

    x = jax.random.normal(kx, (2, in_channels, 16, 16), dtype=jnp.float32)
    weight = jax.random.normal(
        kw, (in_channels, out_channels, kernel_size, kernel_size), dtype=jnp.float32) * 0.1
    bias = jax.random.normal(kb, (out_channels,), dtype=jnp.float32) * 0.1
    gamma = jnp.ones((out_channels,), jnp.float32)              # BatchNorm2d weight init
    beta = jnp.zeros((out_channels,), jnp.float32)              # BatchNorm2d bias init
    prelu_alpha = jnp.full((out_channels,), 0.25, jnp.float32)  # PReLU init

    out = conv_transpose2d_block(
        x, weight, bias, gamma, beta, prelu_alpha,
        stride=stride, padding=padding, output_padding=output_padding,
    )
    out = jax.block_until_ready(out)
    assert out.shape == (2, out_channels, 32, 32), out.shape

    # Reference in the kernel's matmul precision (bf16 operands, f32 accumulation).
    # Tolerance covers the bf16 storage of the intermediate y.
    ref_bf16 = _reference(
        x, weight, bias, gamma, beta, prelu_alpha,
        stride=stride, padding=padding, output_padding=output_padding,
        matmul_dtype=jnp.bfloat16,
    )
    assert jnp.allclose(out, ref_bf16, rtol=2e-2, atol=2e-2), \
        float(jnp.max(jnp.abs(out - ref_bf16)))

    # Full-f32 reference; loose tolerance covers the intentional bf16 MXU-operand cast
    # and the bf16 intermediate.
    ref_f32 = _reference(
        x, weight, bias, gamma, beta, prelu_alpha,
        stride=stride, padding=padding, output_padding=output_padding,
        matmul_dtype=jnp.float32,
    )
    assert jnp.allclose(out, ref_f32, rtol=3e-2, atol=3e-2), \
        float(jnp.max(jnp.abs(out - ref_f32)))

    print("KERNEL_OK")
</pallas_src>

<mosaic_0001>
module attributes {stable_mosaic.version = 11 : i64} {
  func.func @_matmul_stats_kernel(%arg0: i32, %arg1: i32, %arg2: i32, %arg3: memref<1x8x16xbf16, #tpu.memory_space<vmem>>, %arg4: memref<1x1x16x256xbf16, #tpu.memory_space<vmem>>, %arg5: memref<1x1x8x256xbf16, #tpu.memory_space<vmem>>, %arg6: memref<1x1x8x1xf32, #tpu.memory_space<vmem>>, %arg7: memref<1x1x8x1xf32, #tpu.memory_space<vmem>>) attributes {dimension_semantics = [#tpu.dimension_semantics<parallel>, #tpu.dimension_semantics<parallel>, #tpu.dimension_semantics<arbitrary>], iteration_bounds = array<i64: 2, 4, 1>, scalar_prefetch = 0 : i64, scratch_operands = 0 : i64, tpu.core_type = #tpu.core_type<tc>, window_params = [{transform_indices = @transform_0, window_bounds = array<i64: 1, 8, 16>}, {transform_indices = @transform_1, window_bounds = array<i64: 1, 1, 16, 256>}, {transform_indices = @transform_2, window_bounds = array<i64: 1, 1, 8, 256>}, {transform_indices = @transform_3, window_bounds = array<i64: 1, 1, 8, 1>}, {transform_indices = @transform_4, window_bounds = array<i64: 1, 1, 8, 1>}]} {
    %c0_i32 = arith.constant 0 : i32
    %0 = arith.cmpi eq, %arg2, %c0_i32 : i32
    %1 = arith.extui %0 : i1 to i32
    %c0_i32_0 = arith.constant 0 : i32
    %2 = arith.cmpi ne, %1, %c0_i32_0 : i32
    scf.if %2 {
      %cst_29 = arith.constant 0.000000e+00 : f32
      %29 = vector.broadcast %cst_29 : f32 to vector<1x1x8x1xf32>
      %c0_30 = arith.constant 0 : index
      %c0_31 = arith.constant 0 : index
      %c0_32 = arith.constant 0 : index
      %c0_33 = arith.constant 0 : index
      %30 = vector.load %arg6[%c0_30, %c0_31, %c0_32, %c0_33] : memref<1x1x8x1xf32, #tpu.memory_space<vmem>>, vector<1x1x8x1xf32>
      tpu.vector_store %arg6[%c0_30, %c0_31, %c0_32, %c0_33], %29 {strides = array<i32>} : memref<1x1x8x1xf32, #tpu.memory_space<vmem>>, vector<1x1x8x1xf32>,
      %cst_34 = arith.constant 0.000000e+00 : f32
      %31 = vector.broadcast %cst_34 : f32 to vector<1x1x8x1xf32>
      %c0_35 = arith.constant 0 : index
      %c0_36 = arith.constant 0 : index
      %c0_37 = arith.constant 0 : index
      %c0_38 = arith.constant 0 : index
      %32 = vector.load %arg7[%c0_35, %c0_36, %c0_37, %c0_38] : memref<1x1x8x1xf32, #tpu.memory_space<vmem>>, vector<1x1x8x1xf32>
      tpu.vector_store %arg7[%c0_35, %c0_36, %c0_37, %c0_38], %31 {strides = array<i32>} : memref<1x1x8x1xf32, #tpu.memory_space<vmem>>, vector<1x1x8x1xf32>,
    } else {
    }
    %c0 = arith.constant 0 : index
    %c0_1 = arith.constant 0 : index
    %c0_2 = arith.constant 0 : index
    %3 = vector.load %arg3[%c0, %c0_1, %c0_2] : memref<1x8x16xbf16, #tpu.memory_space<vmem>>, vector<1x8x16xbf16>
    %4 = vector.shape_cast %3 : vector<1x8x16xbf16> to vector<8x16xbf16>
    %c0_3 = arith.constant 0 : index
    %c0_4 = arith.constant 0 : index
    %c0_5 = arith.constant 0 : index
    %c0_6 = arith.constant 0 : index
    %5 = vector.load %arg4[%c0_3, %c0_4, %c0_5, %c0_6] : memref<1x1x16x256xbf16, #tpu.memory_space<vmem>>, vector<1x1x16x256xbf16>
    %6 = vector.shape_cast %5 : vector<1x1x16x256xbf16> to vector<16x256xbf16>
    %cst = arith.constant dense<0.000000e+00> : vector<8x256xf32>
    %7 = tpu.matmul %4, %6, %cst {dimension_numbers = #tpu.dot_dimension_numbers<[1], [0], [0], [1], [0, 0, 1, 1], [], []>} : vector<8x16xbf16>, vector<16x256xbf16>, vector<8x256xf32> -> vector<8x256xf32>
    %8 = arith.truncf %7 : vector<8x256xf32> to vector<8x256xbf16>
    %c0_7 = arith.constant 0 : index
    %c0_8 = arith.constant 0 : index
    %c0_9 = arith.constant 0 : index
    %c0_10 = arith.constant 0 : index
    %9 = vector.load %arg5[%c0_7, %c0_8, %c0_9, %c0_10] : memref<1x1x8x256xbf16, #tpu.memory_space<vmem>>, vector<1x1x8x256xbf16>
    %10 = vector.shape_cast %9 : vector<1x1x8x256xbf16> to vector<8x256xbf16>
    %11 = vector.shape_cast %8 : vector<8x256xbf16> to vector<1x1x8x256xbf16>
    tpu.vector_store %arg5[%c0_7, %c0_8, %c0_9, %c0_10], %11 {strides = array<i32>} : memref<1x1x8x256xbf16, #tpu.memory_space<vmem>>, vector<1x1x8x256xbf16>,
    %c0_11 = arith.constant 0 : index
    %c0_12 = arith.constant 0 : index
    %c0_13 = arith.constant 0 : index
    %c0_14 = arith.constant 0 : index
    %12 = vector.load %arg6[%c0_11, %c0_12, %c0_13, %c0_14] : memref<1x1x8x1xf32, #tpu.memory_space<vmem>>, vector<1x1x8x1xf32>
    %13 = vector.shape_cast %12 : vector<1x1x8x1xf32> to vector<8x1xf32>
    %cst_15 = arith.constant dense<0.000000e+00> : vector<8xf32>
    %14 = vector.multi_reduction <add>, %7, %cst_15 [1] : vector<8x256xf32> to vector<8xf32>
    %15 = vector.shape_cast %14 : vector<8xf32> to vector<8x1xf32>
    %16 = arith.addf %13, %15 : vector<8x1xf32>
    %c0_16 = arith.constant 0 : index
    %c0_17 = arith.constant 0 : index
    %c0_18 = arith.constant 0 : index
    %c0_19 = arith.constant 0 : index
    %17 = vector.load %arg6[%c0_16, %c0_17, %c0_18, %c0_19] : memref<1x1x8x1xf32, #tpu.memory_space<vmem>>, vector<1x1x8x1xf32>
    %18 = vector.shape_cast %17 : vector<1x1x8x1xf32> to vector<8x1xf32>
    %19 = vector.shape_cast %16 : vector<8x1xf32> to vector<1x1x8x1xf32>
    tpu.vector_store %arg6[%c0_16, %c0_17, %c0_18, %c0_19], %19 {strides = array<i32>} : memref<1x1x8x1xf32, #tpu.memory_space<vmem>>, vector<1x1x8x1xf32>,
    %c0_20 = arith.constant 0 : index
    %c0_21 = arith.constant 0 : index
    %c0_22 = arith.constant 0 : index
    %c0_23 = arith.constant 0 : index
    %20 = vector.load %arg7[%c0_20, %c0_21, %c0_22, %c0_23] : memref<1x1x8x1xf32, #tpu.memory_space<vmem>>, vector<1x1x8x1xf32>
    %21 = vector.shape_cast %20 : vector<1x1x8x1xf32> to vector<8x1xf32>
    %22 = arith.mulf %7, %7 : vector<8x256xf32>
    %cst_24 = arith.constant dense<0.000000e+00> : vector<8xf32>
    %23 = vector.multi_reduction <add>, %22, %cst_24 [1] : vector<8x256xf32> to vector<8xf32>
    %24 = vector.shape_cast %23 : vector<8xf32> to vector<8x1xf32>
    %25 = arith.addf %21, %24 : vector<8x1xf32>
    %c0_25 = arith.constant 0 : index
    %c0_26 = arith.constant 0 : index
    %c0_27 = arith.constant 0 : index
    %c0_28 = arith.constant 0 : index
    %26 = vector.load %arg7[%c0_25, %c0_26, %c0_27, %c0_28] : memref<1x1x8x1xf32, #tpu.memory_space<vmem>>, vector<1x1x8x1xf32>
    %27 = vector.shape_cast %26 : vector<1x1x8x1xf32> to vector<8x1xf32>
    %28 = vector.shape_cast %25 : vector<8x1xf32> to vector<1x1x8x1xf32>
    tpu.vector_store %arg7[%c0_25, %c0_26, %c0_27, %c0_28], %28 {strides = array<i32>} : memref<1x1x8x1xf32, #tpu.memory_space<vmem>>, vector<1x1x8x1xf32>,
    return
  }
  func.func @transform_0(%arg0: i32, %arg1: i32, %arg2: i32) -> (i32, i32, i32) {
    %c0_i32 = arith.constant 0 : i32
    %c0_i32_0 = arith.constant 0 : i32
    %c0_i32_1 = arith.constant 0 : i32
    return %arg1, %c0_i32, %c0_i32_0 : i32, i32, i32
  }
  func.func @transform_1(%arg0: i32, %arg1: i32, %arg2: i32) -> (i32, i32, i32, i32) {
    %c0_i32 = arith.constant 0 : i32
    %c0_i32_0 = arith.constant 0 : i32
    return %arg0, %arg1, %c0_i32, %arg2 : i32, i32, i32, i32
  }
  func.func @transform_2(%arg0: i32, %arg1: i32, %arg2: i32) -> (i32, i32, i32, i32) {
    %c0_i32 = arith.constant 0 : i32
    %c0_i32_0 = arith.constant 0 : i32
    return %arg0, %arg1, %c0_i32, %arg2 : i32, i32, i32, i32
  }
  func.func @transform_3(%arg0: i32, %arg1: i32, %arg2: i32) -> (i32, i32, i32, i32) {
    %c0_i32 = arith.constant 0 : i32
    %c0_i32_0 = arith.constant 0 : i32
    %c0_i32_1 = arith.constant 0 : i32
    return %arg0, %arg1, %c0_i32, %c0_i32_0 : i32, i32, i32, i32
  }
  func.func @transform_4(%arg0: i32, %arg1: i32, %arg2: i32) -> (i32, i32, i32, i32) {
    %c0_i32 = arith.constant 0 : i32
    %c0_i32_0 = arith.constant 0 : i32
    %c0_i32_1 = arith.constant 0 : i32
    return %arg0, %arg1, %c0_i32, %c0_i32_0 : i32, i32, i32, i32
  }
}

module attributes {stable_mosaic.version = 11 : i64} {
  func.func @_bn_prelu_kernel(%arg0: i32, %arg1: i32, %arg2: i32, %arg3: memref<8x8x1xf32, #tpu.memory_space<vmem>>, %arg4: memref<8x8x1xf32, #tpu.memory_space<vmem>>, %arg5: memref<8x1xf32, #tpu.memory_space<vmem>>, %arg6: memref<8x1xf32, #tpu.memory_space<vmem>>, %arg7: memref<8x1xf32, #tpu.memory_space<vmem>>, %arg8: memref<1x1x8x256xbf16, #tpu.memory_space<vmem>>, %arg9: memref<1x1x8x256xf32, #tpu.memory_space<vmem>>, %arg10: memref<8x1xf32, #tpu.memory_space<vmem>>, %arg11: memref<8x1xf32, #tpu.memory_space<vmem>>) attributes {dimension_semantics = [#tpu.dimension_semantics<parallel>, #tpu.dimension_semantics<parallel>, #tpu.dimension_semantics<arbitrary>], iteration_bounds = array<i64: 2, 4, 1>, scalar_prefetch = 0 : i64, scratch_operands = 2 : i64, tpu.core_type = #tpu.core_type<tc>, window_params = [{pipeline_mode = #tpu.pipeline_mode<synchronous>, transform_indices = @transform_0, window_bounds = array<i64: 8, 8, 1>}, {pipeline_mode = #tpu.pipeline_mode<synchronous>, transform_indices = @transform_1, window_bounds = array<i64: 8, 8, 1>}, {pipeline_mode = #tpu.pipeline_mode<synchronous>, transform_indices = @transform_2, window_bounds = array<i64: 8, 1>}, {pipeline_mode = #tpu.pipeline_mode<synchronous>, transform_indices = @transform_3, window_bounds = array<i64: 8, 1>}, {pipeline_mode = #tpu.pipeline_mode<synchronous>, transform_indices = @transform_4, window_bounds = array<i64: 8, 1>}, {transform_indices = @transform_5, window_bounds = array<i64: 1, 1, 8, 256>}, {transform_indices = @transform_6, window_bounds = array<i64: 1, 1, 8, 256>}]} {
    %c0_i32 = arith.constant 0 : i32
    %0 = arith.cmpi eq, %arg2, %c0_i32 : i32
    %1 = arith.extui %0 : i1 to i32
    %c0_i32_0 = arith.constant 0 : i32
    %2 = arith.cmpi ne, %1, %c0_i32_0 : i32
    scf.if %2 {
      %c0_14 = arith.constant 0 : index
      %c0_15 = arith.constant 0 : index
      %c0_16 = arith.constant 0 : index
      %21 = vector.load %arg3[%c0_14, %c0_15, %c0_16] : memref<8x8x1xf32, #tpu.memory_space<vmem>>, vector<8x8x1xf32>
      %cst_17 = arith.constant dense<0.000000e+00> : vector<8x1xf32>
      %22 = vector.multi_reduction <add>, %21, %cst_17 [0] : vector<8x8x1xf32> to vector<8x1xf32>
      %c0_18 = arith.constant 0 : index
      %c0_19 = arith.constant 0 : index
      %c0_20 = arith.constant 0 : index
      %23 = vector.load %arg4[%c0_18, %c0_19, %c0_20] : memref<8x8x1xf32, #tpu.memory_space<vmem>>, vector<8x8x1xf32>
      %cst_21 = arith.constant dense<0.000000e+00> : vector<8x1xf32>
      %24 = vector.multi_reduction <add>, %23, %cst_21 [0] : vector<8x8x1xf32> to vector<8x1xf32>
      %cst_22 = arith.constant 4.8828125E-4 : f32
      %25 = vector.broadcast %cst_22 : f32 to vector<8x1xf32>
      %26 = arith.mulf %22, %25 : vector<8x1xf32>
      %cst_23 = arith.constant 4.8828125E-4 : f32
      %27 = vector.broadcast %cst_23 : f32 to vector<8x1xf32>
      %28 = arith.mulf %24, %27 : vector<8x1xf32>
      %29 = arith.mulf %26, %26 : vector<8x1xf32>
      %30 = arith.subf %28, %29 : vector<8x1xf32>
      %cst_24 = arith.constant 0.000000e+00 : f32
      %31 = vector.broadcast %cst_24 : f32 to vector<8x1xf32>
      %32 = arith.maximumf %30, %31 : vector<8x1xf32>
      %c0_25 = arith.constant 0 : index
      %c0_26 = arith.constant 0 : index
      %33 = vector.load %arg5[%c0_25, %c0_26] : memref<8x1xf32, #tpu.memory_space<vmem>>, vector<8x1xf32>
      %cst_27 = arith.constant 9.99999974E-6 : f32
      %34 = vector.broadcast %cst_27 : f32 to vector<8x1xf32>
      %35 = arith.addf %32, %34 : vector<8x1xf32>
      %36 = math.rsqrt %35 : vector<8x1xf32>
      %37 = arith.mulf %33, %36 : vector<8x1xf32>
      %c0_28 = arith.constant 0 : index
      %c0_29 = arith.constant 0 : index
      %38 = vector.load %arg10[%c0_28, %c0_29] : memref<8x1xf32, #tpu.memory_space<vmem>>, vector<8x1xf32>
      tpu.vector_store %arg10[%c0_28, %c0_29], %37 {strides = array<i32>} : memref<8x1xf32, #tpu.memory_space<vmem>>, vector<8x1xf32>,
      %c0_30 = arith.constant 0 : index
      %c0_31 = arith.constant 0 : index
      %39 = vector.load %arg6[%c0_30, %c0_31] : memref<8x1xf32, #tpu.memory_space<vmem>>, vector<8x1xf32>
      %40 = arith.mulf %26, %37 : vector<8x1xf32>
      %41 = arith.subf %39, %40 : vector<8x1xf32>
      %c0_32 = arith.constant 0 : index
      %c0_33 = arith.constant 0 : index
      %42 = vector.load %arg11[%c0_32, %c0_33] : memref<8x1xf32, #tpu.memory_space<vmem>>, vector<8x1xf32>
      tpu.vector_store %arg11[%c0_32, %c0_33], %41 {strides = array<i32>} : memref<8x1xf32, #tpu.memory_space<vmem>>, vector<8x1xf32>,
    } else {
    }
    %c0 = arith.constant 0 : index
    %c0_1 = arith.constant 0 : index
    %c0_2 = arith.constant 0 : index
    %c0_3 = arith.constant 0 : index
    %3 = vector.load %arg8[%c0, %c0_1, %c0_2, %c0_3] : memref<1x1x8x256xbf16, #tpu.memory_space<vmem>>, vector<1x1x8x256xbf16>
    %4 = vector.shape_cast %3 : vector<1x1x8x256xbf16> to vector<8x256xbf16>
    %5 = arith.extf %4 : vector<8x256xbf16> to vector<8x256xf32>
    %c0_4 = arith.constant 0 : index
    %c0_5 = arith.constant 0 : index
    %6 = vector.load %arg10[%c0_4, %c0_5] : memref<8x1xf32, #tpu.memory_space<vmem>>, vector<8x1xf32>
    %7 = vector.broadcast %6 : vector<8x1xf32> to vector<8x256xf32>
    %8 = arith.mulf %5, %7 : vector<8x256xf32>
    %c0_6 = arith.constant 0 : index
    %c0_7 = arith.constant 0 : index
    %9 = vector.load %arg11[%c0_6, %c0_7] : memref<8x1xf32, #tpu.memory_space<vmem>>, vector<8x1xf32>
    %10 = vector.broadcast %9 : vector<8x1xf32> to vector<8x256xf32>
    %11 = arith.addf %8, %10 : vector<8x256xf32>
    %cst = arith.constant 0.000000e+00 : f32
    %12 = vector.broadcast %cst : f32 to vector<8x256xf32>
    %13 = arith.cmpf ogt, %11, %12 : vector<8x256xf32>
    %c0_8 = arith.constant 0 : index
    %c0_9 = arith.constant 0 : index
    %14 = vector.load %arg7[%c0_8, %c0_9] : memref<8x1xf32, #tpu.memory_space<vmem>>, vector<8x1xf32>
    %15 = vector.broadcast %14 : vector<8x1xf32> to vector<8x256xf32>
    %16 = arith.mulf %15, %11 : vector<8x256xf32>
    %17 = arith.select %13, %11, %16 : vector<8x256xi1>, vector<8x256xf32>
    %c0_10 = arith.constant 0 : index
    %c0_11 = arith.constant 0 : index
    %c0_12 = arith.constant 0 : index
    %c0_13 = arith.constant 0 : index
    %18 = vector.load %arg9[%c0_10, %c0_11, %c0_12, %c0_13] : memref<1x1x8x256xf32, #tpu.memory_space<vmem>>, vector<1x1x8x256xf32>
    %19 = vector.shape_cast %18 : vector<1x1x8x256xf32> to vector<8x256xf32>
    %20 = vector.shape_cast %17 : vector<8x256xf32> to vector<1x1x8x256xf32>
    tpu.vector_store %arg9[%c0_10, %c0_11, %c0_12, %c0_13], %20 {strides = array<i32>} : memref<1x1x8x256xf32, #tpu.memory_space<vmem>>, vector<1x1x8x256xf32>,
    return
  }
  func.func @transform_0(%arg0: i32, %arg1: i32, %arg2: i32) -> (i32, i32, i32) {
    %c0_i32 = arith.constant 0 : i32
    %c0_i32_0 = arith.constant 0 : i32
    %c0_i32_1 = arith.constant 0 : i32
    %c0_i32_2 = arith.constant 0 : i32
    return %c0_i32, %c0_i32_0, %c0_i32_1 : i32, i32, i32
  }
  func.func @transform_1(%arg0: i32, %arg1: i32, %arg2: i32) -> (i32, i32, i32) {
    %c0_i32 = arith.constant 0 : i32
    %c0_i32_0 = arith.constant 0 : i32
    %c0_i32_1 = arith.constant 0 : i32
    %c0_i32_2 = arith.constant 0 : i32
    return %c0_i32, %c0_i32_0, %c0_i32_1 : i32, i32, i32
  }
  func.func @transform_2(%arg0: i32, %arg1: i32, %arg2: i32) -> (i32, i32) {
    %c0_i32 = arith.constant 0 : i32
    %c0_i32_0 = arith.constant 0 : i32
    %c0_i32_1 = arith.constant 0 : i32
    return %c0_i32, %c0_i32_0 : i32, i32
  }
  func.func @transform_3(%arg0: i32, %arg1: i32, %arg2: i32) -> (i32, i32) {
    %c0_i32 = arith.constant 0 : i32
    %c0_i32_0 = arith.constant 0 : i32
    %c0_i32_1 = arith.constant 0 : i32
    return %c0_i32, %c0_i32_0 : i32, i32
  }
  func.func @transform_4(%arg0: i32, %arg1: i32, %arg2: i32) -> (i32, i32) {
    %c0_i32 = arith.constant 0 : i32
    %c0_i32_0 = arith.constant 0 : i32
    %c0_i32_1 = arith.constant 0 : i32
    return %c0_i32, %c0_i32_0 : i32, i32
  }
  func.func @transform_5(%arg0: i32, %arg1: i32, %arg2: i32) -> (i32, i32, i32, i32) {
    %c0_i32 = arith.constant 0 : i32
    %c0_i32_0 = arith.constant 0 : i32
    return %arg0, %arg1, %c0_i32, %arg2 : i32, i32, i32, i32
  }
  func.func @transform_6(%arg0: i32, %arg1: i32, %arg2: i32) -> (i32, i32, i32, i32) {
    %c0_i32 = arith.constant 0 : i32
    %c0_i32_0 = arith.constant 0 : i32
    return %arg0, %arg1, %c0_i32, %arg2 : i32, i32, i32, i32
  }
}

</mosaic_0001>

<bundles_post_ra>
// kernel: conv_transpose2d_block.3
= control target key start
LH: loop header
LB: loop body
LE: loop exit
PB: predicated region body
PF: predicated region fallthrough
CT: control target
= control target key end

     0   :  { %s669_s21 = smov 0   ;;  %s671_s22 = smov 0   ;;  %s803_s0 = inlined_call_operand.vmem [shape: f32[8,8,1], index: 0, kind: input, shape index: {}]   ;;  %s804_s1 = inlined_call_operand.vmem [shape: f32[8,8,1], index: 1, kind: input, shape index: {}]   ;;  %s805_s2 = inlined_call_operand.vmem [shape: f32[8,1], index: 2, kind: input, shape index: {}]   ;;  %s806_s3 = inlined_call_operand.vmem [shape: f32[8,1], index: 3, kind: input, shape index: {}]   ;;  %s807_s4 = inlined_call_operand.vmem [shape: f32[8,1], index: 4, kind: input, shape index: {}]   ;;  %s808_s5 = inlined_call_operand.vmem [shape: bf16[2,4,8,256], index: 5, kind: input, shape index: {}]   ;;  %s809_s6 = inlined_call_operand.vmem [shape: f32[2,4,8,256], index: 6, kind: output, shape index: {}]  }
   0x1   :  { %s673_s23 = smov 0   ;;  %s675_s24 = smov 0  }
   0x2   :  { %s677_s25 = smov 0  }
   0x3 LB: > { %s31_s26 = sadd.s32 1, %s623_s23  ;;  %s35_s27 = sadd.s32 1, %s627_s24  ;;  %s631_s25 = sphi %s677_s25, %s16_s25   ;;  %s627_s24 = sphi %s675_s24, %s813_s24   ;;  %s623_s23 = sphi %s673_s23, %s812_s23   ;;  %s619_s22 = sphi %s671_s22, %s811_s22   ;;  %s615_s21 = sphi %s669_s21, %s810_s21  }
   0x4   : > { %p33_p0 = scmp.ge.s32.totalorder %s31_s26, 4  ;;  %p539_p1 = scmp.ge.s32.totalorder %s631_s25, 1 }
   0x5   : > { %p248_p2 = scmp.lt.s32.totalorder %s631_s25, 9 }
   0x6   : > { %s815_s26 = smov (%p33_p0, %s31_s26), 0  ;;  %s817_s27 = smov (!%p33_p0, %s35_s27), %s627_s24 }
   0x7   : > { %p249_p3 = pnand %p539_p1, %p248_p2  ;;  %p37_p4 = scmp.ge.s32.totalorder %s817_s27, 2 }
   0x8   : > { %v326_v0 = vld [vmem:[%s803_s0] sm:$0xff] (!%p249_p3)  ;;  %v327_v1 = vld [vmem:[%s803_s0 + $0x8] sm:$0xff] (!%p249_p3)  ;;  %v328_v2 = vld [vmem:[%s803_s0 + $0x10] sm:$0xff] (!%p249_p3)  ;;  %vm334_vm0 = vcmask (!%p249_p3), 7168   ;;  %v633_v3 = vmov (!%p249_p3), 0   ;;  %p295_p5 = scmp.lt.s32.totalorder (!%p249_p3), %s619_s22, 1 }
   0x9   : > { %s819_s27 = smov (%p37_p4, %s817_s27), 0  ;;  %252 = sbr.rel (%p249_p3) target bundleno = 194 (0xc2), region = 44 }
   0xa   : > { %589 = vset.pattern.permute.xlu0 (!%p249_p3), %v633_v3  ;;  %v329_v4 = vld [vmem:[%s803_s0 + $0x18] sm:$0xff] (!%p249_p3)  ;;  %v335_v5 = vsel (!%p249_p3), %vm334_vm0, %v326_v0, 0.0  ;;  %v336_v6 = vsel (!%p249_p3), %vm334_vm0, %v327_v1, 0.0  ;;  %v338_v7 = vsel (!%p249_p3), %vm334_vm0, %v328_v2, 0.0  ;;  %590 = vset.pattern.permute.xlu1 (!%p249_p3), %v633_v3  ;;  %v330_v8 = vld [vmem:[%s803_s0 + $0x20] sm:$0xff] (!%p249_p3)  ;;  %v351_v12 = vld [vmem:[%s804_s1 + $0x8] sm:$0xff] (!%p249_p3) }
   0xb   : > { %v337_v9 = vadd.f32 (!%p249_p3), %v336_v6, %v335_v5  ;;  %v350_v10 = vld [vmem:[%s804_s1] sm:$0xff] (!%p249_p3)  ;;  %v340_v11 = vsel (!%p249_p3), %vm334_vm0, %v329_v4, 0.0  ;;  %v352_v13 = vld [vmem:[%s804_s1 + $0x10] sm:$0xff] (!%p249_p3)  ;;  %v353_v14 = vld [vmem:[%s804_s1 + $0x18] sm:$0xff] (!%p249_p3)  ;;  %v359_v18 = vsel (!%p249_p3), %vm334_vm0, %v351_v12, 0.0  ;;  %v342_v20 = vsel (!%p249_p3), %vm334_vm0, %v330_v8, 0.0 }
   0xc   : > { %v358_v15 = vsel (!%p249_p3), %vm334_vm0, %v350_v10, 0.0  ;;  %v331_v16 = vld [vmem:[%s803_s0 + $0x28] sm:$0xff] (!%p249_p3)  ;;  %v361_v19 = vsel (!%p249_p3), %vm334_vm0, %v352_v13, 0.0  ;;  %v354_v21 = vld [vmem:[%s804_s1 + $0x20] sm:$0xff] (!%p249_p3)  ;;  %v332_v23 = vld [vmem:[%s803_s0 + $0x30] sm:$0xff] (!%p249_p3)  ;;  %v363_v25 = vsel (!%p249_p3), %vm334_vm0, %v353_v14, 0.0 }
   0xd   : > { %v339_v17 = vadd.f32 (!%p249_p3), %v338_v7, %v337_v9  ;;  %v360_v22 = vadd.f32 (!%p249_p3), %v359_v18, %v358_v15  ;;  %v408_v26 = vld [vmem:[%s807_s4] sm:$0xff] (!%p249_p3)  ;;  %v344_v27 = vsel (!%p249_p3), %vm334_vm0, %v331_v16, 0.0  ;;  %v355_v28 = vld [vmem:[%s804_s1 + $0x28] sm:$0xff] (!%p249_p3)  ;;  %v333_v30 = vld [vmem:[%s803_s0 + $0x38] sm:$0xff] (!%p249_p3)  ;;  %v365_v32 = vsel (!%p249_p3), %vm334_vm0, %v354_v21, 0.0  ;;  %p297_p6 = scmp.lt.s32.totalorder (!%p249_p3), %s615_s21, 3 }
   0xe   : > { %411 = vperm.xlu1 (!%p249_p3), %590, %v408_v26   ;;  %v346_v33 = vsel (!%p249_p3), %vm334_vm0, %v332_v23, 0.0  ;;  %v356_v34 = vld [vmem:[%s804_s1 + $0x30] sm:$0xff] (!%p249_p3)  ;;  %v367_v37 = vsel (!%p249_p3), %vm334_vm0, %v355_v28, 0.0  ;;  %v348_v38 = vsel (!%p249_p3), %vm334_vm0, %v333_v30, 0.0  ;;  %v357_v39 = vld [vmem:[%s804_s1 + $0x38] sm:$0xff] (!%p249_p3)  ;;  %v378_v54 = vld [vmem:[%s805_s2] sm:$0xff] (!%p249_p3) }
   0xf   : > { %v341_v24 = vadd.f32 (!%p249_p3), %v340_v11, %v339_v17  ;;  %v362_v29 = vadd.f32 (!%p249_p3), %v361_v19, %v360_v22  ;;  %v369_v42 = vsel (!%p249_p3), %vm334_vm0, %v356_v34, 0.0  ;;  %v371_v45 = vsel (!%p249_p3), %vm334_vm0, %v357_v39, 0.0  ;;  %v383_v57 = vld [vmem:[%s806_s3] sm:$0xff] (!%p249_p3) }
  0x10   : > { %s821_s22 = smov (!%p295_p5, %s619_s22), 1  ;;  %s823_s21 = smov (!%p297_p6, %s615_s21), 3 }
  0x11   : > { %v343_v31 = vadd.f32 %v342_v20, %v341_v24  ;;  %v364_v35 = vadd.f32 %v363_v25, %v362_v29  ;;  %s540_s8 = sshll.u32 %s823_s21, 1  ;;  %s541_s9 = sshll.u32 %s821_s22, 3 }
  0x12   : > { %s304_s10 = sadd.s32 %s541_s9, %s540_s8 }
  0x13   : > { %v345_v36 = vadd.f32 %v344_v27, %v343_v31  ;;  %v366_v40 = vadd.f32 %v365_v32, %v364_v35  ;;  %s542_s11 = sshll.u32 %s304_s10, 2  ;;  %s545_s15 = sshll.u32 %s304_s10, 3 }
  0x14   : > { %s306_s14 = scalar_lea.vmem %s808_s5, %s542_s11  ;;  %s320_s16 = scalar_lea.vmem %s809_s6, %s545_s15 }
  0x15   : > { %v347_v41 = vadd.f32 %v346_v33, %v345_v36  ;;  %v368_v43 = vadd.f32 %v367_v37, %v366_v40  ;;  %v387_v62 = vld [vmem:[%s306_s14] sm:$0xff] }
  0x16   : > { %v388_v63 = vunpack.c.l.bf16 %v387_v62  ;;  %v389_v0 = vunpack.c.h.bf16 %v387_v62 }
  0x17   : > { %v349_v44 = vadd.f32 %v348_v38, %v347_v41  ;;  %v370_v46 = vadd.f32 %v369_v42, %v368_v43 }
  0x19   : > { %v373_v47 = vmul.f32 0.00048828125, %v349_v44  ;;  %v372_v48 = vadd.f32 %v371_v45, %v370_v46 }
  0x1b   : > { %v375_v49 = vmul.f32 %v373_v47, %v373_v47  ;;  %v374_v50 = vmul.f32 0.00048828125, %v372_v48 }
  0x1d   : > { %v376_v51 = vsub.f32 %v374_v50, %v375_v49 }
  0x1f   : > { %v377_v52 = vmax.f32 %v376_v51, 0.0 }
  0x21   : > { %v379_v53 = vadd.f32 1e-05, %v377_v52 }
  0x23   : > { %591 = vrsqrt.f32 %v379_v53 }
  0x2d   : > { %v592_v55 = vpop.eup %591 }
  0x2e   : > { %v381_v56 = vmul.f32 %v592_v55, %v378_v54 }
  0x30   : > { %382 = vst.msk [vmem:[#allocation2] sm:$0xff] %vm334_vm0, %v381_v56  ;;  %v384_v58 = vmul.f32 %v381_v56, %v373_v47 }
  0x32   : > { %v385_v59 = vsub.f32 %v383_v57, %v384_v58 }
  0x34   : > { %386 = vst.msk [vmem:[#allocation3] sm:$0xff] %vm334_vm0, %v385_v59 }
  0x37   : > { %v390_v60 = vld [vmem:[#allocation2] sm:$0xff] }
  0x38   : > { %393 = vperm.xlu0 %589, %v390_v60  }
  0x3b   : > { %v398_v61 = vld [vmem:[#allocation3] sm:$0xff] }
  0x3c   : > { %401 = vperm.xlu0 %589, %v398_v61  }
  0x8d   : > { %v412_v5 = vpop.permute.xlu1 %411 }
  0xb7   : > { %v394_v1 = vpop.permute.xlu0 %393 }
  0xb8   : > { %v396_v2 = vmul.f32 %v394_v1, %v388_v63  ;;  %v397_v3 = vmul.f32 %v394_v1, %v389_v0 }
  0xbb   : > { %v402_v4 = vpop.permute.xlu0 %401 }
  0xbc   : > { %v404_v6 = vadd.f32 %v402_v4, %v396_v2  ;;  %v405_v7 = vadd.f32 %v402_v4, %v397_v3 }
  0xbe   : > { %vm406_vm1 = vcmp.gt.f32.partialorder %v404_v6, 0.0  ;;  %vm407_vm2 = vcmp.gt.f32.partialorder %v405_v7, 0.0  ;;  %v414_v8 = vmul.f32 %v412_v5, %v404_v6  ;;  %v415_v9 = vmul.f32 %v412_v5, %v405_v7 }
  0xc0   : > { %v416_v10 = vsel %vm406_vm1, %v404_v6, %v414_v8  ;;  %v417_v11 = vsel %vm407_vm2, %v405_v7, %v415_v9 }
  0xc1   : > { %418 = vst [vmem:[%s320_s16] sm:$0xff] %v416_v10  ;;  %419 = vst [vmem:[%s320_s16 + $0x8] sm:$0xff] %v417_v11 }
  0xc2 PF: > { %s16_s25 = sadd.s32 1, %s631_s25   ;;  %s810_s21 = smov %s623_s23 }
  0xc3   : > { %p13_p7 = scmp.ge.s32.totalorder %s16_s25, 10   ;;  %s811_s22 = smov %s627_s24 }
  0xc4   : > { %s812_s23 = smov %s815_s26  ;;  %s813_s24 = smov %s819_s27 }
  0xc5   :  { %15 = sbr.rel (!%p13_p7) target bundleno = 3 (0x3), region = 78 }

// kernel: conv_transpose2d_block.2
= control target key start
LH: loop header
LB: loop body
LE: loop exit
PB: predicated region body
PF: predicated region fallthrough
CT: control target
= control target key end

     0   :  { %s772_s15 = smov 0   ;;  %s774_s16 = smov 0   ;;  %s836_s0 = inlined_call_operand.vmem [shape: bf16[4,8,16], index: 0, kind: input, shape index: {}]   ;;  %s837_s1 = inlined_call_operand.vmem [shape: bf16[2,4,16,256], index: 1, kind: input, shape index: {}]   ;;  %s838_s2 = inlined_call_operand.vmem [shape: bf16[2,4,8,256], index: 2, kind: output, shape index: {0}]   ;;  %s839_s3 = inlined_call_operand.vmem [shape: f32[2,4,8,1], index: 3, kind: output, shape index: {1}]   ;;  %s840_s4 = inlined_call_operand.vmem [shape: f32[2,4,8,1], index: 4, kind: output, shape index: {2}]  }
   0x1   :  { %s776_s17 = smov 0   ;;  %s778_s18 = smov 0  }
   0x2   :  { %s780_s19 = smov 0  }
   0x3 LB: > { %s30_s20 = sadd.s32 1, %s735_s17  ;;  %s34_s21 = sadd.s32 1, %s739_s18  ;;  %s743_s19 = sphi %s780_s19, %s15_s19   ;;  %s739_s18 = sphi %s778_s18, %s844_s18   ;;  %s735_s17 = sphi %s776_s17, %s843_s17   ;;  %s731_s16 = sphi %s774_s16, %s842_s16   ;;  %s727_s15 = sphi %s772_s15, %s841_s15  }
   0x4   : > { %p32_p0 = scmp.ge.s32.totalorder %s30_s20, 4  ;;  %p641_p1 = scmp.ge.s32.totalorder %s743_s19, 1 }
   0x5   : > { %p216_p2 = scmp.lt.s32.totalorder %s743_s19, 9 }
   0x6   : > { %s846_s20 = smov (%p32_p0, %s30_s20), 0  ;;  %s848_s21 = smov (!%p32_p0, %s34_s21), %s739_s18 }
   0x7   : > { %p217_p3 = pnand %p641_p1, %p216_p2  ;;  %p36_p4 = scmp.ge.s32.totalorder %s848_s21, 2 }
   0x8   : > { %p278_p5 = scmp.lt.s32.totalorder (!%p217_p3), %s727_s15, 3  ;;  %p283_p6 = scmp.lt.s32.totalorder (!%p217_p3), %s731_s16, 1  ;;  %v745_v0 = vmov (!%p217_p3), 0   ;;  %vm347_vm0 = vcmask (!%p217_p3), 130048   ;;  %vm331_vm1 = vcmask (!%p217_p3), 7168   ;;  %v746_v4 = vmov (!%p217_p3), 0.0  }
   0x9   : > { %s850_s21 = smov (%p36_p4, %s848_s21), 0  ;;  %220 = sbr.rel (%p217_p3) target bundleno = 390 (0x186), region = 28 }
   0xa   : > { %383 = vmatprep.mubr.bf16.mxu0 (!%p217_p3), %v745_v0 }
  0x10   : > { %s852_s15 = smov (!%p278_p5, %s727_s15), 3  ;;  %s854_s16 = smov (!%p283_p6, %s731_s16), 1 }
  0x11   : > { %s642_s22 = sshll.u32 %s852_s15, 2  ;;  %s644_s23 = sshll.u32 %s854_s16, 4 }
  0x12   : > { %s292_s24 = sadd.s32 %s644_s23, %s642_s22  ;;  %s281_s5 = scalar_lea.vmem %s836_s0, %s642_s22 }
  0x13   : > { %s645_s25 = sshll.u32 %s292_s24, 2  ;;  %v334_v3 = vld [vmem:[%s281_s5] sm:$0xf]  ;;  %s649_s6 = sshll.u32 %s854_s16, 2 }
  0x14   : > { %s294_s28 = scalar_lea.vmem %s837_s1, %s645_s25  ;;  %s315_s7 = sadd.s32 %s649_s6, %s852_s15 }
  0x15   : > { %v702_v1 = vld [vmem:[%s294_s28 + $0x4] ss:$8 sps:$4 sm:$0xff]   ;;  %v704_v2 = vld [vmem:[%s294_s28] ss:$8 sps:$4 sm:$0xff]   ;;  %s650_s8 = sshll.u32 %s315_s7, 3  ;;  %s646_s12 = sshll.u32 %s852_s15, 1 }
  0x16   : > { %351 = vmatprep.subr.bf16.mxu0 %v702_v1  ;;  %s317_s11 = scalar_lea.vmem %s839_s3, %s650_s8  ;;  %s647_s13 = sshll.u32 %s854_s16, 3 }
  0x17   : > { %352 = vmatpush1.bf16.msra.mxu0 %v704_v2  ;;  %332 = vst.msk [vmem:[%s317_s11] sm:$0xff] %vm331_vm1, %v746_v4  ;;  %s306_s14 = sadd.s32 %s647_s13, %s646_s12  ;;  %s325_s26 = scalar_lea.vmem %s840_s4, %s650_s8 }
  0x18   : > { %s648_s22 = sshll.u32 %s306_s14, 2  ;;  %333 = vst.msk [vmem:[%s325_s26] sm:$0xff] %vm331_vm1, %v746_v4 }
  0x19   : > { %s308_s25 = scalar_lea.vmem %s838_s2, %s648_s22 }
  0x1a   : > { %655 = vmatmul.mubr.msk.bf16.vlgmr.msra.gmra.mrb[0].mxu0 %vm347_vm0, %v334_v3 }
  0x1e   : > { %v401_v14 = vld [vmem:[%s317_s11] sm:$0xff] }
  0x1f   : > { %v408_v17 = vld [vmem:[%s325_s26] sm:$0xff] }
  0xed   : > { %v385_v5 = vpop.f32.mrb[0].mxu0 }
  0xee   : > { %v387_v6 = vpop.f32.mrb[1].mxu0  ;;  %v409_v7 = vmul.f32 %v385_v5, %v385_v5 }
  0xef   : > { %v659_v8 = vpack.c.bf16 %v387_v6, %v385_v5  ;;  %v389_v9 = vpop.f32.mrb[2].mxu0  ;;  %v402_v10 = vadd.f32 %v387_v6, %v385_v5  ;;  %v410_v11 = vmul.f32 %v387_v6, %v387_v6 }
  0xf0   : > { %v390_v12 = vpop.f32.mrb[3].mxu0 }
  0xf1   : > { %400 = vst [vmem:[%s308_s25] sm:$0xff] %v659_v8  ;;  %403 = vadd.xlane.f32.xlu0 %v402_v10  ;;  %v411_v13 = vadd.f32 %v410_v11, %v409_v7 }
  0xf5   : > { %412 = vadd.xlane.f32.xlu0 %v411_v13 }
 0x17e   : > { %v404_v15 = vpop.xlane.xlu0 %403 }
 0x17f   : > { %v405_v16 = vadd.f32 %v404_v15, %v401_v14 }
 0x181   : > { %407 = vst.msk [vmem:[%s317_s11] sm:$0xff] %vm331_vm1, %v405_v16 }
 0x182   : > { %v413_v18 = vpop.xlane.xlu0 %412 }
 0x183   : > { %v414_v19 = vadd.f32 %v413_v18, %v408_v17 }
 0x185   : > { %415 = vst.msk [vmem:[%s325_s26] sm:$0xff] %vm331_vm1, %v414_v19 }
 0x186 PF: > { %s15_s19 = sadd.s32 1, %s743_s19   ;;  %s841_s15 = smov %s735_s17 }
 0x187   : > { %p12_p7 = scmp.ge.s32.totalorder %s15_s19, 10   ;;  %s842_s16 = smov %s739_s18 }
 0x188   : > { %s843_s17 = smov %s846_s20  ;;  %s844_s18 = smov %s850_s21 }
 0x189   :  { %14 = sbr.rel (!%p12_p7) target bundleno = 3 (0x3), region = 89 }

</bundles_post_ra>
